<compile_context>
chip_gen: v7x
topology: tpu7x:2x2x1
jax: 0.10.0
libtpu: 0.0.40
codegen_flags: <defaults>
</compile_context>

<pallas_src>
import jax
import jax.numpy as jnp
from jax.experimental import pallas as pl
from jax.experimental.pallas import tpu as pltpu


def _round_up(n: int, m: int) -> int:
    return ((n + m - 1) // m) * m


def _rff_classifier_kernel(x_ref, w_ref, b_ref, o_ref):
    # x_ref : (TB, D)  VMEM tile of inputs
    # w_ref : (1, D)   VMEM weight row (broadcast over rows)
    # b_ref : (1, 1)   SMEM scalar bias
    # o_ref : (TB, 1)  VMEM output tile
    x = x_ref[...]
    w = w_ref[...]                                    # (1, D) -> broadcasts
    # VPU multiply + XLU lane reduction (no MXU involvement).
    z = jnp.sum(x * w, axis=-1, keepdims=True)        # (TB, 1) f32
    z = z + b_ref[0, 0]                               # scalar bias from SMEM
    # sigmoid(z) = 1 / (1 + exp(-z)); exp and approx-reciprocal both go to EUP.
    sig = pl.reciprocal(1.0 + jnp.exp(-z), approx=True)
    o_ref[...] = sig.astype(o_ref.dtype)


def rff_binary_classifier(x, weight, bias, *, block_rows=None):
    """Forward pass of RFFBinaryClassifier: sigmoid(x @ weight.T + bias).

    Args:
      x:      (batch, 2*rff_dim) float32
      weight: (1, 2*rff_dim) float32   (PyTorch nn.Linear layout: (out, in))
      bias:   (1,) float32
      block_rows: optional batch-tile size override (rounded to 128).
    Returns:
      (batch, 1) float32
    """
    batch, d = x.shape
    x = x.astype(jnp.float32)

    # --- choose batch tile ---------------------------------------------------
    if block_rows is None:
        # Target ~2 MiB per (lane-padded) x tile per pipeline buffer; with the
        # output tile and double buffering this stays well under the scoped
        # VMEM defaults of every generation (16 MiB v5e, 32 MiB v6e/v7x).
        lane_padded_row_bytes = 4 * max(d, 128)
        block_rows = (2 * 1024 * 1024) // lane_padded_row_bytes
    block_rows = max(128, (int(block_rows) // 128) * 128)
    tb = min(block_rows, _round_up(batch, 128))       # multiple of 128, >= 128

    padded = _round_up(batch, tb)
    grid = padded // tb
    if padded != batch:
        # Pad the ragged tail in the wrapper; keep the steady-state tile large.
        x = jnp.pad(x, ((0, padded - batch), (0, 0)))

    w_row = weight.reshape(1, d).astype(jnp.float32)
    b = bias.reshape(1, 1).astype(jnp.float32)

    cost = pl.CostEstimate(
        flops=2 * padded * d,
        transcendentals=padded,
        bytes_accessed=4 * (padded * d + d + padded + 1),
    )

    out = pl.pallas_call(
        _rff_classifier_kernel,
        out_shape=jax.ShapeDtypeStruct((padded, 1), jnp.float32),
        grid=(grid,),
        in_specs=[
            pl.BlockSpec((tb, d), lambda i: (i, 0)),                 # x tile
            pl.BlockSpec((1, d), lambda i: (0, 0)),                  # weight row
            pl.BlockSpec(memory_space=pltpu.MemorySpace.SMEM),       # bias scalar
        ],
        out_specs=pl.BlockSpec((tb, 1), lambda i: (i, 0)),
        compiler_params=pltpu.CompilerParams(
            dimension_semantics=("parallel",)),
        cost_estimate=cost,
    )(x, w_row, b)

    return out[:batch]


if __name__ == "__main__":
    rff_dim = 16
    in_features = rff_dim * 2          # 32

    key = jax.random.PRNGKey(0)
    kx, kw, kb, kx2 = jax.random.split(key, 4)

    # Deterministic params mimicking PyTorch nn.Linear default init:
    # U(-1/sqrt(in_features), 1/sqrt(in_features))
    bound = 1.0 / float(in_features) ** 0.5
    weight = jax.random.uniform(kw, (1, in_features), jnp.float32,
                                minval=-bound, maxval=bound)
    bias = jax.random.uniform(kb, (1,), jnp.float32,
                              minval=-bound, maxval=bound)

    # Case 1: tiny batch (single padded tile).
    batch = 8
    x = jax.random.normal(kx, (batch, in_features), jnp.float32)
    out = jax.block_until_ready(rff_binary_classifier(x, weight, bias))
    ref = jax.nn.sigmoid(x @ weight.T + bias)
    assert out.shape == (batch, 1)
    assert jnp.allclose(out, ref, atol=2e-3, rtol=2e-3)

    # Case 2: ragged batch spanning several grid steps (exercises pipelining
    # and the wrapper padding path) with a small forced tile size.
    batch2 = 1000
    x2 = jax.random.normal(kx2, (batch2, in_features), jnp.float32)
    out2 = jax.block_until_ready(
        rff_binary_classifier(x2, weight, bias, block_rows=128))
    ref2 = jax.nn.sigmoid(x2 @ weight.T + bias)
    assert out2.shape == (batch2, 1)
    assert jnp.allclose(out2, ref2, atol=2e-3, rtol=2e-3)

    print("KERNEL_OK")
</pallas_src>

<mosaic_0001>
module attributes {stable_mosaic.version = 11 : i64} {
  func.func @_rff_classifier_kernel(%arg0: i32, %arg1: memref<128x32xf32, #tpu.memory_space<vmem>>, %arg2: memref<1x32xf32, #tpu.memory_space<vmem>>, %arg3: memref<1x1xf32, #tpu.memory_space<smem>>, %arg4: memref<128x1xf32, #tpu.memory_space<vmem>>) attributes {dimension_semantics = [#tpu.dimension_semantics<parallel>], iteration_bounds = array<i64: 1>, scalar_prefetch = 0 : i64, scratch_operands = 0 : i64, tpu.core_type = #tpu.core_type<tc>, window_params = [{transform_indices = @transform_0, window_bounds = array<i64: 128, 32>}, {pipeline_mode = #tpu.pipeline_mode<synchronous>, transform_indices = @transform_1, window_bounds = array<i64: 1, 32>}, {transform_indices = @transform_2, window_bounds = array<i64: 1, 1>}, {transform_indices = @transform_3, window_bounds = array<i64: 128, 1>}]} {
    %c0 = arith.constant 0 : index
    %c0_0 = arith.constant 0 : index
    %0 = vector.load %arg1[%c0, %c0_0] : memref<128x32xf32, #tpu.memory_space<vmem>>, vector<128x32xf32>
    %c0_1 = arith.constant 0 : index
    %c0_2 = arith.constant 0 : index
    %1 = vector.load %arg2[%c0_1, %c0_2] : memref<1x32xf32, #tpu.memory_space<vmem>>, vector<1x32xf32>
    %2 = vector.broadcast %1 : vector<1x32xf32> to vector<128x32xf32>
    %3 = arith.mulf %0, %2 : vector<128x32xf32>
    %cst = arith.constant dense<0.000000e+00> : vector<128xf32>
    %4 = vector.multi_reduction <add>, %3, %cst [1] : vector<128x32xf32> to vector<128xf32>
    %5 = vector.shape_cast %4 : vector<128xf32> to vector<128x1xf32>
    %c0_3 = arith.constant 0 : index
    %c0_4 = arith.constant 0 : index
    %6 = memref.load %arg3[%c0_3, %c0_4] : memref<1x1xf32, #tpu.memory_space<smem>>
    %7 = vector.broadcast %6 : f32 to vector<128x1xf32>
    %8 = arith.addf %5, %7 : vector<128x1xf32>
    %cst_5 = arith.constant 0.000000e+00 : f32
    %9 = vector.broadcast %cst_5 : f32 to vector<128x1xf32>
    %10 = arith.subf %9, %8 : vector<128x1xf32>
    %11 = math.exp %10 : vector<128x1xf32>
    %cst_6 = arith.constant 1.000000e+00 : f32
    %12 = vector.broadcast %cst_6 : f32 to vector<128x1xf32>
    %13 = arith.addf %12, %11 : vector<128x1xf32>
    %14 = tpu.reciprocal %13 {approx = true} : vector<128x1xf32> -> vector<128x1xf32>
    %c0_7 = arith.constant 0 : index
    %c0_8 = arith.constant 0 : index
    %15 = vector.load %arg4[%c0_7, %c0_8] : memref<128x1xf32, #tpu.memory_space<vmem>>, vector<128x1xf32>
    tpu.vector_store %arg4[%c0_7, %c0_8], %14 {strides = array<i32>} : memref<128x1xf32, #tpu.memory_space<vmem>>, vector<128x1xf32>,
    return
  }
  func.func @transform_0(%arg0: i32) -> (i32, i32) {
    %c0_i32 = arith.constant 0 : i32
    %c0_i32_0 = arith.constant 0 : i32
    return %arg0, %c0_i32 : i32, i32
  }
  func.func @transform_1(%arg0: i32) -> (i32, i32) {
    %c0_i32 = arith.constant 0 : i32
    %c0_i32_0 = arith.constant 0 : i32
    %c0_i32_1 = arith.constant 0 : i32
    return %c0_i32, %c0_i32_0 : i32, i32
  }
  func.func @transform_2(%arg0: i32) -> (i32, i32) {
    %c0_i32 = arith.constant 0 : i32
    %c0_i32_0 = arith.constant 0 : i32
    %c0_i32_1 = arith.constant 0 : i32
    return %c0_i32, %c0_i32_0 : i32, i32
  }
  func.func @transform_3(%arg0: i32) -> (i32, i32) {
    %c0_i32 = arith.constant 0 : i32
    %c0_i32_0 = arith.constant 0 : i32
    return %arg0, %c0_i32 : i32, i32
  }
}

</mosaic_0001>

<bundles_post_ra>
// kernel: tpu_custom_call.1
= control target key start
LH: loop header
LB: loop body
LE: loop exit
PB: predicated region body
PF: predicated region fallthrough
CT: control target
= control target key end

     0   :  { %vm54_vm0 = vcmask 261120   ;;  %vm201_vm1 = vcmask 7168   ;;  %s459_s0 = inlined_call_operand.vmem [shape: f32[128,32], index: 0, kind: input, shape index: {}]   ;;  %s460_s1 = inlined_call_operand.vmem [shape: f32[1,32], index: 1, kind: input, shape index: {}]   ;;  %s461_s2 = inlined_call_operand.<no memory space> [shape: f32[1,1], index: 2, kind: input, shape index: {}]   ;;  %s462_s3 = inlined_call_operand.vmem [shape: f32[128,1], index: 3, kind: output, shape index: {}]  }
   0x1   :  { %v17_v0 = vld [vmem:[%s459_s0 + $0x10] sm:$0xff]  ;;  %v222_v1 = vld [vmem:[%s460_s1] ss:$0 sm:$0xff]  ;;  %v18_v5 = vld [vmem:[%s459_s0 + $0x18] sm:$0xff]  ;;  %v377_v49 = vstv %s461_s2 }
   0x2   :  { %v15_v2 = vld [vmem:[%s459_s0] sm:$0xff]  ;;  %v40_v3 = vmul.f32 %v222_v1, %v17_v0  ;;  %v16_v6 = vld [vmem:[%s459_s0 + $0x8] sm:$0xff]  ;;  %v41_v7 = vmul.f32 %v222_v1, %v18_v5  ;;  %v22_v17 = vld [vmem:[%s459_s0 + $0x38] sm:$0xff] }
   0x3   :  { %v38_v4 = vmul.f32 %v222_v1, %v15_v2  ;;  %v39_v8 = vmul.f32 %v222_v1, %v16_v6  ;;  %v20_v9 = vld [vmem:[%s459_s0 + $0x28] sm:$0xff]  ;;  %v19_v10 = vld [vmem:[%s459_s0 + $0x20] sm:$0xff]  ;;  %v21_v18 = vld [vmem:[%s459_s0 + $0x30] sm:$0xff]  ;;  %v45_v21 = vmul.f32 %v222_v1, %v22_v17 }
   0x4   :  { %v61_v11 = vsel %vm54_vm0, %v40_v3, 0.0  ;;  %v64_v13 = vsel %vm54_vm0, %v41_v7, 0.0  ;;  %v43_v15 = vmul.f32 %v222_v1, %v20_v9  ;;  %v42_v16 = vmul.f32 %v222_v1, %v19_v10  ;;  %v24_v23 = vld [vmem:[%s459_s0 + $0x48] sm:$0xff]  ;;  %v23_v24 = vld [vmem:[%s459_s0 + $0x40] sm:$0xff]  ;;  %v26_v29 = vld [vmem:[%s459_s0 + $0x58] sm:$0xff] }
   0x5   :  { %v55_v12 = vsel %vm54_vm0, %v38_v4, 0.0  ;;  %62 = vadd.xlane.f32.xlu1 %v61_v11  ;;  %v58_v14 = vsel %vm54_vm0, %v39_v8, 0.0  ;;  %v44_v22 = vmul.f32 %v222_v1, %v21_v18  ;;  %v76_v25 = vsel %vm54_vm0, %v45_v21, 0.0  ;;  %v25_v30 = vld [vmem:[%s459_s0 + $0x50] sm:$0xff]  ;;  %v28_v35 = vld [vmem:[%s459_s0 + $0x68] sm:$0xff]  ;;  %v27_v36 = vld [vmem:[%s459_s0 + $0x60] sm:$0xff] }
   0x6   :  { %56 = vadd.xlane.f32.xlu0 %v55_v12  ;;  %v70_v19 = vsel %vm54_vm0, %v43_v15, 0.0  ;;  %v67_v20 = vsel %vm54_vm0, %v42_v16, 0.0  ;;  %v47_v27 = vmul.f32 %v222_v1, %v24_v23  ;;  %v46_v28 = vmul.f32 %v222_v1, %v23_v24  ;;  %v30_v41 = vld [vmem:[%s459_s0 + $0x78] sm:$0xff]  ;;  %v29_v42 = vld [vmem:[%s459_s0 + $0x70] sm:$0xff] }
   0x7   :  { %v73_v26 = vsel %vm54_vm0, %v44_v22, 0.0  ;;  %v49_v33 = vmul.f32 %v222_v1, %v26_v29  ;;  %v48_v34 = vmul.f32 %v222_v1, %v25_v30  ;;  %v51_v39 = vmul.f32 %v222_v1, %v28_v35 }
   0x8   :  { %v82_v31 = vsel %vm54_vm0, %v47_v27, 0.0  ;;  %v79_v32 = vsel %vm54_vm0, %v46_v28, 0.0  ;;  %v50_v40 = vmul.f32 %v222_v1, %v27_v36  ;;  %v53_v45 = vmul.f32 %v222_v1, %v30_v41 }
   0x9   :  { %65 = vadd.xlane.f32.xlu1 %v64_v13  ;;  %v88_v37 = vsel %vm54_vm0, %v49_v33, 0.0  ;;  %v85_v38 = vsel %vm54_vm0, %v48_v34, 0.0  ;;  %v94_v43 = vsel %vm54_vm0, %v51_v39, 0.0  ;;  %v52_v46 = vmul.f32 %v222_v1, %v29_v42 }
   0xa   :  { %59 = vadd.xlane.f32.xlu0 %v58_v14  ;;  %v91_v44 = vsel %vm54_vm0, %v50_v40, 0.0  ;;  %v100_v47 = vsel %vm54_vm0, %v53_v45, 0.0 }
   0xb   :  { %v97_v48 = vsel %vm54_vm0, %v52_v46, 0.0 }
   0xd   :  { %71 = vadd.xlane.f32.xlu1 %v70_v19 }
   0xe   :  { %68 = vadd.xlane.f32.xlu0 %v67_v20 }
  0x11   :  { %77 = vadd.xlane.f32.xlu1 %v76_v25 }
  0x12   :  { %74 = vadd.xlane.f32.xlu0 %v73_v26 }
  0x15   :  { %83 = vadd.xlane.f32.xlu1 %v82_v31 }
  0x16   :  { %80 = vadd.xlane.f32.xlu0 %v79_v32 }
  0x19   :  { %89 = vadd.xlane.f32.xlu1 %v88_v37 }
  0x1a   :  { %86 = vadd.xlane.f32.xlu0 %v85_v38 }
  0x1d   :  { %95 = vadd.xlane.f32.xlu1 %v94_v43 }
  0x1e   :  { %92 = vadd.xlane.f32.xlu0 %v91_v44 }
  0x21   :  { %101 = vadd.xlane.f32.xlu1 %v100_v47 }
  0x22   :  { %98 = vadd.xlane.f32.xlu0 %v97_v48 }
  0x92   :  { %v63_v50 = vpop.xlane.xlu1 %62 }
  0x93   :  { %v57_v51 = vpop.xlane.xlu0 %56  ;;  %v107_v52 = vadd.f32 %v377_v49, %v63_v50 }
  0x94   :  { %v105_v53 = vadd.f32 %v377_v49, %v57_v51 }
  0x95   :  { %v123_v54 = vsub.f32 0.0, %v107_v52 }
  0x96   :  { %v121_v55 = vsub.f32 0.0, %v105_v53  ;;  %v66_v56 = vpop.xlane.xlu1 %65 }
  0x97   :  { %v60_v57 = vpop.xlane.xlu0 %59  ;;  %v141_v58 = vmul.f32 1.442695, %v123_v54  ;;  %v108_v60 = vadd.f32 %v377_v49, %v66_v56 }
  0x98   :  { %v137_v59 = vmul.f32 1.442695, %v121_v55  ;;  %v106_v61 = vadd.f32 %v377_v49, %v60_v57 }
  0x99   :  { %223 = vpow2.f32 %v141_v58  ;;  %v124_v62 = vsub.f32 0.0, %v108_v60 }
  0x9a   :  { %v122_v63 = vsub.f32 0.0, %v106_v61  ;;  %225 = vpow2.f32 %v137_v59  ;;  %v72_v0 = vpop.xlane.xlu1 %71 }
  0x9b   :  { %v69_v1 = vpop.xlane.xlu0 %68  ;;  %v143_v2 = vmul.f32 1.442695, %v124_v62  ;;  %v110_v4 = vadd.f32 %v377_v49, %v72_v0 }
  0x9c   :  { %v139_v3 = vmul.f32 1.442695, %v122_v63  ;;  %v109_v5 = vadd.f32 %v377_v49, %v69_v1 }
  0x9d   :  { %227 = vpow2.f32 %v143_v2  ;;  %v126_v6 = vsub.f32 0.0, %v110_v4 }
  0x9e   :  { %v125_v7 = vsub.f32 0.0, %v109_v5  ;;  %229 = vpow2.f32 %v139_v3  ;;  %v78_v8 = vpop.xlane.xlu1 %77 }
  0x9f   :  { %v75_v9 = vpop.xlane.xlu0 %74  ;;  %v147_v10 = vmul.f32 1.442695, %v126_v6  ;;  %v112_v12 = vadd.f32 %v377_v49, %v78_v8 }
  0xa0   :  { %v145_v11 = vmul.f32 1.442695, %v125_v7  ;;  %v111_v13 = vadd.f32 %v377_v49, %v75_v9 }
  0xa1   :  { %231 = vpow2.f32 %v147_v10  ;;  %v128_v14 = vsub.f32 0.0, %v112_v12 }
  0xa2   :  { %v127_v15 = vsub.f32 0.0, %v111_v13  ;;  %233 = vpow2.f32 %v145_v11  ;;  %v84_v16 = vpop.xlane.xlu1 %83 }
  0xa3   :  { %v81_v17 = vpop.xlane.xlu0 %80  ;;  %v224_v18 = vpop.eup %223  ;;  %v151_v19 = vmul.f32 1.442695, %v128_v14  ;;  %v114_v20 = vadd.f32 %v377_v49, %v84_v16 }
  0xa4   :  { %v113_v21 = vadd.f32 %v377_v49, %v81_v17  ;;  %v226_v22 = vpop.eup %225  ;;  %v171_v23 = vadd.f32 1.0, %v224_v18  ;;  %v149_v24 = vmul.f32 1.442695, %v127_v15 }
  0xa5   :  { %v169_v25 = vadd.f32 1.0, %v226_v22  ;;  %235 = vpow2.f32 %v151_v19  ;;  %v130_v26 = vsub.f32 0.0, %v114_v20 }
  0xa6   :  { %v129_v27 = vsub.f32 0.0, %v113_v21  ;;  %237 = vrcp.f32 %v171_v23  ;;  %v90_v28 = vpop.xlane.xlu1 %89 }
  0xa7   :  { %v87_v29 = vpop.xlane.xlu0 %86  ;;  %v228_v30 = vpop.eup %227  ;;  %239 = vrcp.f32 %v169_v25  ;;  %v155_v31 = vmul.f32 1.442695, %v130_v26  ;;  %v116_v32 = vadd.f32 %v377_v49, %v90_v28 }
  0xa8   :  { %v230_v33 = vpop.eup %229  ;;  %v172_v34 = vadd.f32 1.0, %v228_v30  ;;  %241 = vpow2.f32 %v149_v24  ;;  %v153_v35 = vmul.f32 1.442695, %v129_v27  ;;  %v115_v36 = vadd.f32 %v377_v49, %v87_v29 }
  0xa9   :  { %v170_v37 = vadd.f32 1.0, %v230_v33  ;;  %243 = vpow2.f32 %v155_v31  ;;  %v132_v38 = vsub.f32 0.0, %v116_v32 }
  0xaa   :  { %245 = vrcp.f32 %v172_v34  ;;  %v131_v39 = vsub.f32 0.0, %v115_v36  ;;  %v96_v40 = vpop.xlane.xlu1 %95 }
  0xab   :  { %v93_v41 = vpop.xlane.xlu0 %92  ;;  %v232_v42 = vpop.eup %231  ;;  %247 = vrcp.f32 %v170_v37  ;;  %v159_v43 = vmul.f32 1.442695, %v132_v38  ;;  %v118_v44 = vadd.f32 %v377_v49, %v96_v40 }
  0xac   :  { %v117_v45 = vadd.f32 %v377_v49, %v93_v41  ;;  %v234_v46 = vpop.eup %233  ;;  %v174_v47 = vadd.f32 1.0, %v232_v42  ;;  %249 = vpow2.f32 %v153_v35  ;;  %v157_v48 = vmul.f32 1.442695, %v131_v39 }
  0xad   :  { %v173_v50 = vadd.f32 1.0, %v234_v46  ;;  %251 = vpow2.f32 %v159_v43  ;;  %v134_v51 = vsub.f32 0.0, %v118_v44 }
  0xae   :  { %v133_v52 = vsub.f32 0.0, %v117_v45  ;;  %253 = vrcp.f32 %v174_v47  ;;  %v102_v53 = vpop.xlane.xlu1 %101 }
  0xaf   :  { %v99_v54 = vpop.xlane.xlu0 %98  ;;  %v236_v55 = vpop.eup %235  ;;  %255 = vrcp.f32 %v173_v50  ;;  %v163_v56 = vmul.f32 1.442695, %v134_v51  ;;  %v120_v58 = vadd.f32 %v377_v49, %v102_v53 }
  0xb0   :  { %v161_v57 = vmul.f32 1.442695, %v133_v52  ;;  %v238_v59 = vpop.eup %237  ;;  %v176_v60 = vadd.f32 1.0, %v236_v55  ;;  %257 = vpow2.f32 %v157_v48  ;;  %v119_v61 = vadd.f32 %v377_v49, %v99_v54 }
  0xb1   :  { %v240_v62 = vpop.eup %239  ;;  %204 = vst.msk [vmem:[%s462_s3 + $0x10] sm:$0xff] %vm201_vm1, %v238_v59  ;;  %259 = vpow2.f32 %v163_v56  ;;  %v136_v63 = vsub.f32 0.0, %v120_v58 }
  0xb2   :  { %v242_v0 = vpop.eup %241  ;;  %202 = vst.msk [vmem:[%s462_s3] sm:$0xff] %vm201_vm1, %v240_v62  ;;  %261 = vrcp.f32 %v176_v60  ;;  %v135_v1 = vsub.f32 0.0, %v119_v61 }
  0xb3   :  { %v244_v2 = vpop.eup %243  ;;  %v175_v3 = vadd.f32 1.0, %v242_v0  ;;  %263 = vpow2.f32 %v161_v57  ;;  %v167_v49 = vmul.f32 1.442695, %v136_v63 }
  0xb4   :  { %v246_v4 = vpop.eup %245  ;;  %v178_v5 = vadd.f32 1.0, %v244_v2  ;;  %v165_v6 = vmul.f32 1.442695, %v135_v1 }
  0xb5   :  { %v248_v7 = vpop.eup %247  ;;  %205 = vst.msk [vmem:[%s462_s3 + $0x18] sm:$0xff] %vm201_vm1, %v246_v4  ;;  %265 = vrcp.f32 %v175_v3 }
  0xb6   :  { %v250_v8 = vpop.eup %249  ;;  %203 = vst.msk [vmem:[%s462_s3 + $0x8] sm:$0xff] %vm201_vm1, %v248_v7  ;;  %267 = vrcp.f32 %v178_v5 }
  0xb7   :  { %v252_v9 = vpop.eup %251  ;;  %v177_v10 = vadd.f32 1.0, %v250_v8  ;;  %269 = vpow2.f32 %v167_v49 }
  0xb8   :  { %v254_v11 = vpop.eup %253  ;;  %v180_v12 = vadd.f32 1.0, %v252_v9  ;;  %271 = vpow2.f32 %v165_v6 }
  0xb9   :  { %v256_v13 = vpop.eup %255  ;;  %207 = vst.msk [vmem:[%s462_s3 + $0x28] sm:$0xff] %vm201_vm1, %v254_v11  ;;  %273 = vrcp.f32 %v177_v10 }
  0xba   :  { %v258_v14 = vpop.eup %257  ;;  %206 = vst.msk [vmem:[%s462_s3 + $0x20] sm:$0xff] %vm201_vm1, %v256_v13  ;;  %275 = vrcp.f32 %v180_v12 }
  0xbb   :  { %v260_v15 = vpop.eup %259  ;;  %v179_v16 = vadd.f32 1.0, %v258_v14 }
  0xbc   :  { %v262_v17 = vpop.eup %261  ;;  %v182_v18 = vadd.f32 1.0, %v260_v15 }
  0xbd   :  { %v264_v19 = vpop.eup %263  ;;  %209 = vst.msk [vmem:[%s462_s3 + $0x38] sm:$0xff] %vm201_vm1, %v262_v17  ;;  %277 = vrcp.f32 %v179_v16 }
  0xbe   :  { %279 = vrcp.f32 %v182_v18  ;;  %v181_v20 = vadd.f32 1.0, %v264_v19 }
  0xbf   :  { %v266_v21 = vpop.eup %265 }
  0xc0   :  { %v268_v22 = vpop.eup %267  ;;  %208 = vst.msk [vmem:[%s462_s3 + $0x30] sm:$0xff] %vm201_vm1, %v266_v21  ;;  %281 = vrcp.f32 %v181_v20 }
  0xc1   :  { %v270_v23 = vpop.eup %269  ;;  %211 = vst.msk [vmem:[%s462_s3 + $0x48] sm:$0xff] %vm201_vm1, %v268_v22 }
  0xc2   :  { %v272_v24 = vpop.eup %271  ;;  %v184_v25 = vadd.f32 1.0, %v270_v23 }
  0xc3   :  { %v274_v26 = vpop.eup %273  ;;  %v183_v27 = vadd.f32 1.0, %v272_v24 }
  0xc4   :  { %v276_v28 = vpop.eup %275  ;;  %210 = vst.msk [vmem:[%s462_s3 + $0x40] sm:$0xff] %vm201_vm1, %v274_v26  ;;  %283 = vrcp.f32 %v184_v25 }
  0xc5   :  { %213 = vst.msk [vmem:[%s462_s3 + $0x58] sm:$0xff] %vm201_vm1, %v276_v28  ;;  %285 = vrcp.f32 %v183_v27 }
  0xc7   :  { %v278_v29 = vpop.eup %277 }
  0xc8   :  { %v280_v30 = vpop.eup %279  ;;  %212 = vst.msk [vmem:[%s462_s3 + $0x50] sm:$0xff] %vm201_vm1, %v278_v29 }
  0xc9   :  { %215 = vst.msk [vmem:[%s462_s3 + $0x68] sm:$0xff] %vm201_vm1, %v280_v30 }
  0xca   :  { %v282_v31 = vpop.eup %281 }
  0xcb   :  { %214 = vst.msk [vmem:[%s462_s3 + $0x60] sm:$0xff] %vm201_vm1, %v282_v31 }
  0xce   :  { %v284_v32 = vpop.eup %283 }
  0xcf   :  { %v286_v33 = vpop.eup %285  ;;  %217 = vst.msk [vmem:[%s462_s3 + $0x78] sm:$0xff] %vm201_vm1, %v284_v32 }
  0xd0   :  { %216 = vst.msk [vmem:[%s462_s3 + $0x70] sm:$0xff] %vm201_vm1, %v286_v33 }

</bundles_post_ra>
